<compile_context>
chip_gen: v6e
topology: v6e:2x2x1
jax: 0.10.0
libtpu: 0.0.40
codegen_flags: <defaults>
</compile_context>

<pallas_src>
import jax
import jax.numpy as jnp
from jax.experimental import pallas as pl
from jax.experimental.pallas import tpu as pltpu

_MIB = 1024 * 1024
_TM_TARGET = {7: 512, 6: 512, 5: 256}


# ---------------------------------------------------------------------------
# Kernels
# ---------------------------------------------------------------------------

def ffn_kernel_resident(x_ref, w1t_ref, b1_ref, w2t_ref, b2_ref, o_ref):
    """Single-pass FFN: full (pre-transposed) weights resident in VMEM."""
    h = jnp.dot(x_ref[...], w1t_ref[...], preferred_element_type=jnp.float32)
    h = jnp.maximum(h + b1_ref[...], 0.0)
    # Dropout == identity in eval mode.
    y = jnp.dot(h.astype(w2t_ref.dtype), w2t_ref[...],
                preferred_element_type=jnp.float32)
    o_ref[...] = (y + b2_ref[...]).astype(o_ref.dtype)


def ffn_kernel_stream(x_ref, w1t_ref, b1_ref, w2t_ref, b2_ref, o_ref, acc_ref):
    """Streaming FFN: d_ff tiled along grid axis 1 (reduction axis)."""
    k = pl.program_id(1)

    @pl.when(k == 0)
    def _():
        acc_ref[...] = jnp.zeros_like(acc_ref)

    h = jnp.dot(x_ref[...], w1t_ref[...], preferred_element_type=jnp.float32)
    h = jnp.maximum(h + b1_ref[...], 0.0)
    # Dropout == identity in eval mode.
    acc_ref[...] += jnp.dot(h.astype(w2t_ref.dtype), w2t_ref[...],
                            preferred_element_type=jnp.float32)

    @pl.when(k == pl.num_programs(1) - 1)
    def _():
        o_ref[...] = (acc_ref[...] + b2_ref[...]).astype(o_ref.dtype)


# ---------------------------------------------------------------------------
# Host-side planning helpers
# ---------------------------------------------------------------------------

def _round_up(x, m):
    return (x + m - 1) // m * m


def _device_kind():
    try:
        return jax.devices()[0].device_kind.lower()
    except Exception:
        return ""


def _tpu_generation():
    kind = _device_kind()
    for gen, tags in ((7, ("v7", "7x")), (6, ("v6",)), (5, ("v5",)), (4, ("v4",))):
        if any(t in kind for t in tags):
            return gen
    return 0


def _vmem_capacity_bytes(gen):
    cap = None
    try:
        cap = int(getattr(pltpu.get_tpu_info(), "vmem_capacity_bytes", 0)) or None
    except Exception:
        cap = None
    if cap is None:
        cap = 64 * _MIB if gen >= 7 else 128 * _MIB
    if gen >= 7:                       # v7x: 64 MiB per TensorCore, hard cap
        cap = min(cap, 64 * _MIB)
    return cap


def _resident_vmem_bytes(tm, d_model, d_ff, in_isz, out_isz):
    return int(
        2 * tm * d_model * in_isz                  # x tiles (double-buffered)
        + 2 * tm * d_model * out_isz               # out tiles (double-buffered)
        + 2 * d_model * d_ff * in_isz              # w1t + w2t (single-buffered)
        + (d_ff + d_model) * in_isz                # biases
        + 2 * tm * d_ff * 4                        # f32 hidden temp (+ slack)
        + 2 * tm * d_model * 4                     # f32 output temp (+ slack)
    )


def _stream_vmem_bytes(tm, tf, d_model, in_isz, out_isz):
    return int(
        2 * tm * d_model * in_isz                  # x tiles
        + 2 * d_model * tf * in_isz                # w1t slabs (double-buffered)
        + 2 * tf * d_model * in_isz                # w2t slabs (double-buffered)
        + (2 * tf + d_model) * in_isz              # biases
        + 2 * tm * d_model * out_isz               # out tiles
        + tm * d_model * 4                         # f32 accumulator scratch
        + 2 * tm * tf * 4                          # f32 hidden temp (+ slack)
        + tm * d_model * 4                         # partial-product temp
    )


def _pick_row_tile(n, target, align):
    """Largest legal row tile <= target; prefers tiles dividing n (no pad)."""
    if n <= target:
        return n                                   # full-extent block, no pad
    best = max((target // align) * align, align)
    cand = best
    while cand >= align:
        if n % cand == 0:
            return cand                            # divides n -> no pad/slice
        cand -= align
    return best                                    # no divisor -> caller pads


def _plan_tiles(n, d_model, d_ff, in_isz, out_isz, budget, gen,
                allow_single_buffer, *, ff_tile, align):
    tm_target = _TM_TARGET.get(gen, 256)

    targets = []
    t = tm_target
    while t >= align:
        if t not in targets:
            targets.append(t)
        t //= 2
    if align not in targets:
        targets.append(align)

    # Manual d_ff tile override (used for testing the streaming kernel).
    if ff_tile is not None and 0 < ff_tile <= d_ff:
        if ff_tile == d_ff or (d_ff % ff_tile == 0 and ff_tile % 128 == 0):
            return _pick_row_tile(n, tm_target, align), int(ff_tile)

    def resident_bytes(tm):
        need = _resident_vmem_bytes(tm, d_model, d_ff, in_isz, out_isz)
        if not allow_single_buffer:                # weights double-buffered
            need += 2 * d_model * d_ff * in_isz
        return need

    # Preferred: weights fully resident (weights DMA'd once total, no acc pass).
    for target in targets:
        tm = _pick_row_tile(n, target, align)
        if resident_bytes(tm) <= budget:
            return tm, d_ff

    # Fallback: stream d_ff slabs over a reduction grid axis.
    tf_cands = [t for t in range(min(d_ff, 2048), 127, -128) if d_ff % t == 0]
    if not tf_cands:
        tf_cands = [d_ff]                          # d_ff not tileable by 128
    for target in targets:
        tm = _pick_row_tile(n, target, align)
        for tf in tf_cands:
            if _stream_vmem_bytes(tm, tf, d_model, in_isz, out_isz) <= budget:
                return tm, tf
    return _pick_row_tile(n, align, align), tf_cands[-1]


# ---------------------------------------------------------------------------
# Public API
# ---------------------------------------------------------------------------

def prepare_ffn_params(w1, b1, w2, b2, dtype=None):
    """Pre-transpose / reshape FFN weights ONCE at parameter-load time.

    PyTorch nn.Linear convention: w1 [d_ff, d_model], b1 [d_ff],
    w2 [d_model, d_ff], b2 [d_model].  Pass dtype=jnp.bfloat16 to feed the MXU
    in bf16 (accumulation stays f32 inside the kernel).
    """
    d_ff, d_model = w1.shape
    w1t = jnp.asarray(w1).T                        # [d_model, d_ff]
    w2t = jnp.asarray(w2).T                        # [d_ff, d_model]
    b1r = jnp.asarray(b1).reshape(1, d_ff)
    b2r = jnp.asarray(b2).reshape(1, d_model)
    if dtype is not None:
        w1t, b1r, w2t, b2r = (a.astype(dtype) for a in (w1t, b1r, w2t, b2r))
    return w1t, b1r, w2t, b2r


def positionwise_ffn(x, params, *, ff_tile=None):
    """x: [batch, seq, d_model] -> [batch, seq, d_model].

    `params` comes from prepare_ffn_params (weights already transposed).
    Dropout is inference-mode (identity), matching module.eval().
    """
    w1t, b1r, w2t, b2r = params
    batch, seq, d_model = x.shape
    d_ff = w1t.shape[1]
    n = batch * seq

    out_dtype = x.dtype
    compute_dtype = w1t.dtype
    xc = x.astype(compute_dtype) if x.dtype != compute_dtype else x
    x2 = xc.reshape(n, d_model)

    in_isz = jnp.dtype(compute_dtype).itemsize
    out_isz = jnp.dtype(out_dtype).itemsize
    align = 16 if in_isz == 2 else 8
    gen = _tpu_generation()
    cap = _vmem_capacity_bytes(gen)
    budget = int(cap * 0.8)                        # leave headroom for compiler scratch

    def run(allow_single_buffer):
        tm, tf = _plan_tiles(n, d_model, d_ff, in_isz, out_isz, budget, gen,
                             allow_single_buffer, ff_tile=ff_tile, align=align)

        # v7x has 2 TensorCores: make sure the "parallel" row axis has >= 2
        # steps so both cores get work (no-op on 1-TC v5e/v6e).
        if gen >= 7 and n // tm <= 1 and n >= 2 * align and n % (2 * align) == 0:
            tm = n // 2

        n_pad = n if n % tm == 0 else _round_up(n, tm)
        xp = x2 if n_pad == n else jnp.pad(x2, ((0, n_pad - n), (0, 0)))

        resident = (tf == d_ff)
        if resident:
            need = _resident_vmem_bytes(tm, d_model, d_ff, in_isz, out_isz)
            if not allow_single_buffer:
                need += 2 * d_model * d_ff * in_isz
        else:
            need = _stream_vmem_bytes(tm, tf, d_model, in_isz, out_isz)
        # Derived from actual buffer counts, clamped to the real device budget.
        vmem_limit = int(min(max(2 * need, 32 * _MIB), int(cap * 0.875)))

        def spec(shape, index_map, constant=False):
            # Constant-block-index inputs never re-DMA; single-buffer them to
            # free VMEM (matters most on v7x's 64 MiB).
            if constant and allow_single_buffer and hasattr(pl, "Buffered"):
                try:
                    return pl.BlockSpec(shape, index_map,
                                        pipeline_mode=pl.Buffered(1))
                except TypeError:
                    pass
            return pl.BlockSpec(shape, index_map)

        if resident:
            grid = (n_pad // tm,)
            in_specs = [
                pl.BlockSpec((tm, d_model), lambda i: (i, 0)),
                spec((d_model, d_ff), lambda i: (0, 0), constant=True),
                spec((1, d_ff), lambda i: (0, 0), constant=True),
                spec((d_ff, d_model), lambda i: (0, 0), constant=True),
                spec((1, d_model), lambda i: (0, 0), constant=True),
            ]
            out_specs = pl.BlockSpec((tm, d_model), lambda i: (i, 0))
            scratch = []
            kernel = ffn_kernel_resident
            dims = ("parallel",)
        else:
            grid = (n_pad // tm, d_ff // tf)
            in_specs = [
                pl.BlockSpec((tm, d_model), lambda i, k: (i, 0)),
                pl.BlockSpec((d_model, tf), lambda i, k: (0, k)),
                pl.BlockSpec((1, tf), lambda i, k: (0, k)),
                pl.BlockSpec((tf, d_model), lambda i, k: (k, 0)),
                spec((1, d_model), lambda i, k: (0, 0), constant=True),
            ]
            out_specs = pl.BlockSpec((tm, d_model), lambda i, k: (i, 0))
            scratch = [pltpu.VMEM((tm, d_model), jnp.float32)]
            kernel = ffn_kernel_stream
            dims = ("parallel", "arbitrary")

        out = pl.pallas_call(
            kernel,
            out_shape=jax.ShapeDtypeStruct((n_pad, d_model), out_dtype),
            grid_spec=pltpu.PrefetchScalarGridSpec(
                num_scalar_prefetch=0,
                grid=grid,
                in_specs=in_specs,
                out_specs=out_specs,
                scratch_shapes=scratch,
            ),
            compiler_params=pltpu.CompilerParams(
                dimension_semantics=dims,
                vmem_limit_bytes=vmem_limit,
            ),
        )(xp, w1t, b1r, w2t, b2r)
        return out[:n] if n_pad != n else out

    try:
        out2 = run(allow_single_buffer=True)
    except Exception:
        # pl.Buffered(1) single-buffering is an optional optimization; fall
        # back to default double-buffering if this Pallas/Mosaic rejects it.
        out2 = run(allow_single_buffer=False)

    return out2.reshape(batch, seq, d_model)


# ---------------------------------------------------------------------------
# Demo / self-check
# ---------------------------------------------------------------------------

def _init_linear(key, out_features, in_features):
    # Deterministic init mimicking nn.Linear (uniform +/- 1/sqrt(fan_in)).
    kw, kb = jax.random.split(key)
    bound = 1.0 / jnp.sqrt(in_features)
    w = jax.random.uniform(kw, (out_features, in_features), jnp.float32, -bound, bound)
    b = jax.random.uniform(kb, (out_features,), jnp.float32, -bound, bound)
    return w, b


if __name__ == "__main__":
    batch, seq, d_model, d_ff = 2, 8, 32, 256

    key = jax.random.PRNGKey(0)
    kx, k1, k2 = jax.random.split(key, 3)
    x = jax.random.normal(kx, (batch, seq, d_model), jnp.float32)
    w1, b1 = _init_linear(k1, d_ff, d_model)
    w2, b2 = _init_linear(k2, d_model, d_ff)

    # Pre-transpose once (parameter-load time), not per forward call.
    params = prepare_ffn_params(w1, b1, w2, b2)

    # Pure-JAX reference (dropout is identity in eval mode).
    y_ref = jnp.maximum(x @ w1.T + b1, 0.0) @ w2.T + b2

    # Resident-weights path (weights fit in VMEM -> single-pass kernel).
    y = jax.block_until_ready(positionwise_ffn(x, params))
    assert y.shape == (batch, seq, d_model)
    assert jnp.allclose(y, y_ref, atol=1e-4, rtol=1e-4), "resident path mismatch"

    # Streamed-weights path (force a d_ff tile to exercise the accumulator kernel).
    y_s = jax.block_until_ready(positionwise_ffn(x, params, ff_tile=128))
    assert jnp.allclose(y_s, y_ref, atol=1e-4, rtol=1e-4), "streaming path mismatch"

    print("KERNEL_OK")
</pallas_src>

<mosaic_0001>
module attributes {stable_mosaic.version = 11 : i64} {
  func.func @ffn_kernel_resident(%arg0: i32, %arg1: memref<16x32xf32, #tpu.memory_space<vmem>>, %arg2: memref<32x256xf32, #tpu.memory_space<vmem>>, %arg3: memref<1x256xf32, #tpu.memory_space<vmem>>, %arg4: memref<256x32xf32, #tpu.memory_space<vmem>>, %arg5: memref<1x32xf32, #tpu.memory_space<vmem>>, %arg6: memref<16x32xf32, #tpu.memory_space<vmem>>) attributes {dimension_semantics = [#tpu.dimension_semantics<parallel>], iteration_bounds = array<i64: 1>, scalar_prefetch = 0 : i64, scratch_operands = 0 : i64, tpu.core_type = #tpu.core_type<tc>, window_params = [{transform_indices = @transform_0, window_bounds = array<i64: 16, 32>}, {pipeline_mode = #tpu.pipeline_mode<synchronous>, transform_indices = @transform_1, window_bounds = array<i64: 32, 256>}, {pipeline_mode = #tpu.pipeline_mode<synchronous>, transform_indices = @transform_2, window_bounds = array<i64: 1, 256>}, {pipeline_mode = #tpu.pipeline_mode<synchronous>, transform_indices = @transform_3, window_bounds = array<i64: 256, 32>}, {pipeline_mode = #tpu.pipeline_mode<synchronous>, transform_indices = @transform_4, window_bounds = array<i64: 1, 32>}, {transform_indices = @transform_5, window_bounds = array<i64: 16, 32>}]} {
    %c0 = arith.constant 0 : index
    %c0_0 = arith.constant 0 : index
    %0 = vector.load %arg1[%c0, %c0_0] : memref<16x32xf32, #tpu.memory_space<vmem>>, vector<16x32xf32>
    %c0_1 = arith.constant 0 : index
    %c0_2 = arith.constant 0 : index
    %1 = vector.load %arg2[%c0_1, %c0_2] : memref<32x256xf32, #tpu.memory_space<vmem>>, vector<32x256xf32>
    %cst = arith.constant dense<0.000000e+00> : vector<16x256xf32>
    %2 = tpu.matmul %0, %1, %cst {dimension_numbers = #tpu.dot_dimension_numbers<[1], [0], [0], [1], [0, 0, 1, 1], [], []>} : vector<16x32xf32>, vector<32x256xf32>, vector<16x256xf32> -> vector<16x256xf32>
    %c0_3 = arith.constant 0 : index
    %c0_4 = arith.constant 0 : index
    %3 = vector.load %arg3[%c0_3, %c0_4] : memref<1x256xf32, #tpu.memory_space<vmem>>, vector<1x256xf32>
    %4 = vector.broadcast %3 : vector<1x256xf32> to vector<16x256xf32>
    %5 = arith.addf %2, %4 : vector<16x256xf32>
    %cst_5 = arith.constant 0.000000e+00 : f32
    %6 = vector.broadcast %cst_5 : f32 to vector<16x256xf32>
    %7 = arith.maximumf %5, %6 : vector<16x256xf32>
    %c0_6 = arith.constant 0 : index
    %c0_7 = arith.constant 0 : index
    %8 = vector.load %arg4[%c0_6, %c0_7] : memref<256x32xf32, #tpu.memory_space<vmem>>, vector<256x32xf32>
    %cst_8 = arith.constant dense<0.000000e+00> : vector<16x32xf32>
    %9 = tpu.matmul %7, %8, %cst_8 {dimension_numbers = #tpu.dot_dimension_numbers<[1], [0], [0], [1], [0, 0, 1, 1], [], []>} : vector<16x256xf32>, vector<256x32xf32>, vector<16x32xf32> -> vector<16x32xf32>
    %c0_9 = arith.constant 0 : index
    %c0_10 = arith.constant 0 : index
    %10 = vector.load %arg5[%c0_9, %c0_10] : memref<1x32xf32, #tpu.memory_space<vmem>>, vector<1x32xf32>
    %11 = vector.broadcast %10 : vector<1x32xf32> to vector<16x32xf32>
    %12 = arith.addf %9, %11 : vector<16x32xf32>
    %c0_11 = arith.constant 0 : index
    %c0_12 = arith.constant 0 : index
    %13 = vector.load %arg6[%c0_11, %c0_12] : memref<16x32xf32, #tpu.memory_space<vmem>>, vector<16x32xf32>
    tpu.vector_store %arg6[%c0_11, %c0_12], %12 {strides = array<i32>} : memref<16x32xf32, #tpu.memory_space<vmem>>, vector<16x32xf32>,
    return
  }
  func.func @transform_0(%arg0: i32) -> (i32, i32) {
    %c0_i32 = arith.constant 0 : i32
    %c0_i32_0 = arith.constant 0 : i32
    return %arg0, %c0_i32 : i32, i32
  }
  func.func @transform_1(%arg0: i32) -> (i32, i32) {
    %c0_i32 = arith.constant 0 : i32
    %c0_i32_0 = arith.constant 0 : i32
    %c0_i32_1 = arith.constant 0 : i32
    return %c0_i32, %c0_i32_0 : i32, i32
  }
  func.func @transform_2(%arg0: i32) -> (i32, i32) {
    %c0_i32 = arith.constant 0 : i32
    %c0_i32_0 = arith.constant 0 : i32
    %c0_i32_1 = arith.constant 0 : i32
    return %c0_i32, %c0_i32_0 : i32, i32
  }
  func.func @transform_3(%arg0: i32) -> (i32, i32) {
    %c0_i32 = arith.constant 0 : i32
    %c0_i32_0 = arith.constant 0 : i32
    %c0_i32_1 = arith.constant 0 : i32
    return %c0_i32, %c0_i32_0 : i32, i32
  }
  func.func @transform_4(%arg0: i32) -> (i32, i32) {
    %c0_i32 = arith.constant 0 : i32
    %c0_i32_0 = arith.constant 0 : i32
    %c0_i32_1 = arith.constant 0 : i32
    return %c0_i32, %c0_i32_0 : i32, i32
  }
  func.func @transform_5(%arg0: i32) -> (i32, i32) {
    %c0_i32 = arith.constant 0 : i32
    %c0_i32_0 = arith.constant 0 : i32
    return %arg0, %c0_i32 : i32, i32
  }
}

module attributes {stable_mosaic.version = 11 : i64} {
  func.func @ffn_kernel_resident(%arg0: i32, %arg1: memref<16x32xf32, #tpu.memory_space<vmem>>, %arg2: memref<32x256xf32, #tpu.memory_space<vmem>>, %arg3: memref<1x256xf32, #tpu.memory_space<vmem>>, %arg4: memref<256x32xf32, #tpu.memory_space<vmem>>, %arg5: memref<1x32xf32, #tpu.memory_space<vmem>>, %arg6: memref<16x32xf32, #tpu.memory_space<vmem>>) attributes {dimension_semantics = [#tpu.dimension_semantics<parallel>], iteration_bounds = array<i64: 1>, scalar_prefetch = 0 : i64, scratch_operands = 0 : i64, tpu.core_type = #tpu.core_type<tc>, window_params = [{transform_indices = @transform_0, window_bounds = array<i64: 16, 32>}, {pipeline_mode = #tpu.pipeline_mode<synchronous>, transform_indices = @transform_1, window_bounds = array<i64: 32, 256>}, {pipeline_mode = #tpu.pipeline_mode<synchronous>, transform_indices = @transform_2, window_bounds = array<i64: 1, 256>}, {pipeline_mode = #tpu.pipeline_mode<synchronous>, transform_indices = @transform_3, window_bounds = array<i64: 256, 32>}, {pipeline_mode = #tpu.pipeline_mode<synchronous>, transform_indices = @transform_4, window_bounds = array<i64: 1, 32>}, {transform_indices = @transform_5, window_bounds = array<i64: 16, 32>}]} {
    %c0 = arith.constant 0 : index
    %c0_0 = arith.constant 0 : index
    %0 = vector.load %arg1[%c0, %c0_0] : memref<16x32xf32, #tpu.memory_space<vmem>>, vector<16x32xf32>
    %c0_1 = arith.constant 0 : index
    %c0_2 = arith.constant 0 : index
    %1 = vector.load %arg2[%c0_1, %c0_2] : memref<32x256xf32, #tpu.memory_space<vmem>>, vector<32x256xf32>
    %cst = arith.constant dense<0.000000e+00> : vector<16x256xf32>
    %2 = tpu.matmul %0, %1, %cst {dimension_numbers = #tpu.dot_dimension_numbers<[1], [0], [0], [1], [0, 0, 1, 1], [], []>} : vector<16x32xf32>, vector<32x256xf32>, vector<16x256xf32> -> vector<16x256xf32>
    %c0_3 = arith.constant 0 : index
    %c0_4 = arith.constant 0 : index
    %3 = vector.load %arg3[%c0_3, %c0_4] : memref<1x256xf32, #tpu.memory_space<vmem>>, vector<1x256xf32>
    %4 = vector.broadcast %3 : vector<1x256xf32> to vector<16x256xf32>
    %5 = arith.addf %2, %4 : vector<16x256xf32>
    %cst_5 = arith.constant 0.000000e+00 : f32
    %6 = vector.broadcast %cst_5 : f32 to vector<16x256xf32>
    %7 = arith.maximumf %5, %6 : vector<16x256xf32>
    %c0_6 = arith.constant 0 : index
    %c0_7 = arith.constant 0 : index
    %8 = vector.load %arg4[%c0_6, %c0_7] : memref<256x32xf32, #tpu.memory_space<vmem>>, vector<256x32xf32>
    %cst_8 = arith.constant dense<0.000000e+00> : vector<16x32xf32>
    %9 = tpu.matmul %7, %8, %cst_8 {dimension_numbers = #tpu.dot_dimension_numbers<[1], [0], [0], [1], [0, 0, 1, 1], [], []>} : vector<16x256xf32>, vector<256x32xf32>, vector<16x32xf32> -> vector<16x32xf32>
    %c0_9 = arith.constant 0 : index
    %c0_10 = arith.constant 0 : index
    %10 = vector.load %arg5[%c0_9, %c0_10] : memref<1x32xf32, #tpu.memory_space<vmem>>, vector<1x32xf32>
    %11 = vector.broadcast %10 : vector<1x32xf32> to vector<16x32xf32>
    %12 = arith.addf %9, %11 : vector<16x32xf32>
    %c0_11 = arith.constant 0 : index
    %c0_12 = arith.constant 0 : index
    %13 = vector.load %arg6[%c0_11, %c0_12] : memref<16x32xf32, #tpu.memory_space<vmem>>, vector<16x32xf32>
    tpu.vector_store %arg6[%c0_11, %c0_12], %12 {strides = array<i32>} : memref<16x32xf32, #tpu.memory_space<vmem>>, vector<16x32xf32>,
    return
  }
  func.func @transform_0(%arg0: i32) -> (i32, i32) {
    %c0_i32 = arith.constant 0 : i32
    %c0_i32_0 = arith.constant 0 : i32
    return %arg0, %c0_i32 : i32, i32
  }
  func.func @transform_1(%arg0: i32) -> (i32, i32) {
    %c0_i32 = arith.constant 0 : i32
    %c0_i32_0 = arith.constant 0 : i32
    %c0_i32_1 = arith.constant 0 : i32
    return %c0_i32, %c0_i32_0 : i32, i32
  }
  func.func @transform_2(%arg0: i32) -> (i32, i32) {
    %c0_i32 = arith.constant 0 : i32
    %c0_i32_0 = arith.constant 0 : i32
    %c0_i32_1 = arith.constant 0 : i32
    return %c0_i32, %c0_i32_0 : i32, i32
  }
  func.func @transform_3(%arg0: i32) -> (i32, i32) {
    %c0_i32 = arith.constant 0 : i32
    %c0_i32_0 = arith.constant 0 : i32
    %c0_i32_1 = arith.constant 0 : i32
    return %c0_i32, %c0_i32_0 : i32, i32
  }
  func.func @transform_4(%arg0: i32) -> (i32, i32) {
    %c0_i32 = arith.constant 0 : i32
    %c0_i32_0 = arith.constant 0 : i32
    %c0_i32_1 = arith.constant 0 : i32
    return %c0_i32, %c0_i32_0 : i32, i32
  }
  func.func @transform_5(%arg0: i32) -> (i32, i32) {
    %c0_i32 = arith.constant 0 : i32
    %c0_i32_0 = arith.constant 0 : i32
    return %arg0, %c0_i32 : i32, i32
  }
}

</mosaic_0001>

<bundles_post_ra>
// kernel: tpu_custom_call.1
= control target key start
LH: loop header
LB: loop body
LE: loop exit
PB: predicated region body
PF: predicated region fallthrough
CT: control target
= control target key end

     0   :  { %v330_v4 = vmov 0.0   ;;  %vm43_vm0 = vcmask 261120   ;;  %s503_s0 = inlined_call_operand.vmem [shape: f32[16,32], index: 0, kind: input, shape index: {}]   ;;  %s504_s1 = inlined_call_operand.vmem [shape: f32[32,256], index: 1, kind: input, shape index: {}]   ;;  %s505_s2 = inlined_call_operand.vmem [shape: f32[1,256], index: 2, kind: input, shape index: {}]   ;;  %s506_s3 = inlined_call_operand.vmem [shape: f32[256,32], index: 3, kind: input, shape index: {}]   ;;  %s507_s4 = inlined_call_operand.vmem [shape: f32[1,32], index: 4, kind: input, shape index: {}]   ;;  %s508_s5 = inlined_call_operand.hbm [shape: f32[16,32], index: 5, kind: output, shape index: {}]  }
   0x1   :  { %v30_v0 = vld [vmem:[%s504_s1 + $0x38] sm:$0xff]  ;;  %v29_v1 = vld [vmem:[%s504_s1 + $0x30] sm:$0xff]  ;;  %v28_v2 = vld [vmem:[%s504_s1 + $0x28] sm:$0xff]  ;;  %114 = vmatprep.mubr.f32.mxu0 %v330_v4 }
   0x2   :  { %74 = vmatprep.subr.mxu0 %v30_v0  ;;  %v27_v3 = vld [vmem:[%s504_s1 + $0x20] sm:$0xff]  ;;  %v26_v5 = vld [vmem:[%s504_s1 + $0x18] sm:$0xff]  ;;  %v25_v6 = vld [vmem:[%s504_s1 + $0x10] sm:$0xff] }
   0x3   :  { %75 = vmatpush1.msra.mxu0 %v29_v1  ;;  %v162_v7 = vld [vmem:[%s506_s3 + $0xf8] sm:$0xff]  ;;  %v24_v9 = vld [vmem:[%s504_s1 + $0x8] sm:$0xff]  ;;  %v161_v10 = vld [vmem:[%s506_s3 + $0xf0] sm:$0xff] }
   0x4   :  { %76 = vmatprep.subr.mxu0 %v28_v2  ;;  %v146_v8 = vld [vmem:[%s506_s3 + $0x78] sm:$0xff]  ;;  %266 = vmatprep.subr.mxu1 %v162_v7  ;;  %v145_v11 = vld [vmem:[%s506_s3 + $0x70] sm:$0xff]  ;;  %v23_v12 = vld [vmem:[%s504_s1] sm:$0xff] }
   0x5   :  { %77 = vmatpush1.msra.mxu0 %v27_v3  ;;  %267 = vmatpush3.msra.mxu1 %v146_v8  ;;  %v160_v13 = vld [vmem:[%s506_s3 + $0xe8] sm:$0xff]  ;;  %v21_v14 = vld [vmem:[%s503_s0] sm:$0xff]  ;;  %v158_v18 = vld [vmem:[%s506_s3 + $0xd8] sm:$0xff] }
   0x6   :  { %78 = vmatprep.subr.mxu0 %v26_v5  ;;  %268 = vmatprep.subr.mxu1 %v161_v10  ;;  %v144_v15 = vld [vmem:[%s506_s3 + $0x68] sm:$0xff]  ;;  %v159_v16 = vld [vmem:[%s506_s3 + $0xe0] sm:$0xff]  ;;  %v142_v20 = vld [vmem:[%s506_s3 + $0x58] sm:$0xff] }
   0x7   :  { %79 = vmatpush1.msra.mxu0 %v25_v6  ;;  %269 = vmatpush3.msra.mxu1 %v145_v11  ;;  %v143_v17 = vld [vmem:[%s506_s3 + $0x60] sm:$0xff]  ;;  %v22_v19 = vld [vmem:[%s503_s0 + $0x8] sm:$0xff]  ;;  %v157_v21 = vld [vmem:[%s506_s3 + $0xd0] sm:$0xff] }
   0x8   :  { %80 = vmatprep.subr.mxu0 %v24_v9  ;;  %270 = vmatprep.subr.mxu1 %v160_v13 }
   0x9   :  { %81 = vmatpush1.msra.mxu0 %v23_v12  ;;  %271 = vmatpush3.msra.mxu1 %v144_v15 }
   0xa   :  { %263 = vmatmul.mubr.msk.f32.vlgmr.msra.gmra.mxu0 %vm43_vm0, %v21_v14  ;;  %272 = vmatprep.subr.mxu1 %v159_v16 }
   0xb   :  { %120 = vmatprep.mubr.f32.mxu0 %v330_v4  ;;  %273 = vmatpush3.msra.mxu1 %v143_v17 }
   0xc   :  { %10 = vsyncpa [#allocation3], 0  ;;  %274 = vmatprep.subr.mxu1 %v158_v18  ;;  %v141_v22 = vld [vmem:[%s506_s3 + $0x50] sm:$0xff]  ;;  %v156_v23 = vld [vmem:[%s506_s3 + $0xc8] sm:$0xff]  ;;  %v33_v43 = vlaneseq  ;;  %s331_s24 = smov [#allocation2]  }
   0xd   :  { %275 = vmatpush3.msra.mxu1 %v142_v20  ;;  %v140_v24 = vld [vmem:[%s506_s3 + $0x48] sm:$0xff]  ;;  %v155_v25 = vld [vmem:[%s506_s3 + $0xc0] sm:$0xff]  ;;  %v154_v27 = vld [vmem:[%s506_s3 + $0xb8] sm:$0xff]  ;;  %s252_s25 = sshll.u32 %s331_s24, 4  ;;  %s253_s25 = int_to_ptr.vmem [resolvable:$true] %s252_s25 }
   0xe   :  { %264 = vmatmul.mubr.msk.f32.gmra.mxu0 %vm43_vm0, %v22_v19  ;;  %276 = vmatprep.subr.mxu1 %v157_v21  ;;  %v139_v26 = vld [vmem:[%s506_s3 + $0x40] sm:$0xff]  ;;  %v138_v28 = vld [vmem:[%s506_s3 + $0x38] sm:$0xff]  ;;  %v153_v29 = vld [vmem:[%s506_s3 + $0xb0] sm:$0xff]  ;;  %v34_v44 = vshrl.u32 %v33_v43, 7  ;;  %s308_s26 = scalar_lea.vmem %s253_s25, 256  ;;  %p313_p1 = scmp.lt.s32.totalorder %s253_s25, %s253_s25 }
   0xf   :  { %277 = vmatpush3.msra.mxu1 %v141_v22  ;;  %v137_v30 = vld [vmem:[%s506_s3 + $0x30] sm:$0xff]  ;;  %v152_v31 = vld [vmem:[%s506_s3 + $0xa8] sm:$0xff]  ;;  %v151_v33 = vld [vmem:[%s506_s3 + $0xa0] sm:$0xff]  ;;  %p309_p0 = scmp.ne.s32.totalorder %s253_s25, %s308_s26  ;;  %p314_p2 = scmp.lt.s32.totalorder %s308_s26, %s308_s26 }
  0x10   :  { %278 = vmatprep.subr.mxu1 %v156_v23  ;;  %v136_v32 = vld [vmem:[%s506_s3 + $0x28] sm:$0xff]  ;;  %v135_v34 = vld [vmem:[%s506_s3 + $0x20] sm:$0xff]  ;;  %v150_v35 = vld [vmem:[%s506_s3 + $0x98] sm:$0xff]  ;;  %v35_v45 = vsub.s32 0, %v34_v44  ;;  %v39_v47 = vsub.s32 1, %v34_v44 }
  0x11   :  { %279 = vmatpush3.msra.mxu1 %v140_v24  ;;  %v134_v36 = vld [vmem:[%s506_s3 + $0x18] sm:$0xff]  ;;  %v149_v37 = vld [vmem:[%s506_s3 + $0x90] sm:$0xff]  ;;  %v148_v39 = vld [vmem:[%s506_s3 + $0x88] sm:$0xff]  ;;  %p315_p3 = por %p314_p2, %p313_p1 }
  0x12   :  { %280 = vmatprep.subr.mxu1 %v155_v25  ;;  %v133_v38 = vld [vmem:[%s506_s3 + $0x10] sm:$0xff]  ;;  %v132_v40 = vld [vmem:[%s506_s3 + $0x8] sm:$0xff]  ;;  %v147_v41 = vld [vmem:[%s506_s3 + $0x80] sm:$0xff] }
  0x13   :  { %281 = vmatpush3.msra.mxu1 %v139_v26  ;;  %v131_v42 = vld [vmem:[%s506_s3] sm:$0xff]  ;;  %p316_p4 = pnand %p315_p3, %p309_p0 }
  0x14   :  { %282 = vmatprep.subr.mxu1 %v154_v27  ;;  %v31_v46 = vld [vmem:[%s505_s2] sm:$0x3] }
  0x15   :  { %283 = vmatpush3.msra.mxu1 %v138_v28  ;;  %v36_v48 = vrot.slane %v31_v46, %v35_v45  ;;  %v40_v49 = vrot.slane %v31_v46, %v39_v47  ;;  %v265_v63 = vld [vmem:[%s507_s4] ss:$0 sm:$0xff] }
  0x16   :  { %284 = vmatprep.subr.mxu1 %v153_v29 }
  0x17   :  { %285 = vmatpush3.msra.mxu1 %v137_v30 }
  0x18   :  { %286 = vmatprep.subr.mxu1 %v152_v31 }
  0x19   :  { %287 = vmatpush3.msra.mxu1 %v136_v32 }
  0x1a   :  { %288 = vmatprep.subr.mxu1 %v151_v33 }
  0x1b   :  { %289 = vmatpush3.msra.mxu1 %v135_v34 }
  0x1c   :  { %290 = vmatprep.subr.mxu1 %v150_v35 }
  0x1d   :  { %291 = vmatpush3.msra.mxu1 %v134_v36 }
  0x1e   :  { %292 = vmatprep.subr.mxu1 %v149_v37 }
  0x1f   :  { %293 = vmatpush3.msra.mxu1 %v133_v38 }
  0x20   :  { %294 = vmatprep.subr.mxu1 %v148_v39 }
  0x21   :  { %295 = vmatpush3.msra.mxu1 %v132_v40 }
  0x22   :  { %296 = vmatprep.subr.mxu1 %v147_v41 }
  0x23   :  { %297 = vmatpush3.msra.mxu1 %v131_v42 }
  0xca   :  { %v116_v50 = vpop.f32.mrf.mxu0 }
  0xcb   :  { %v117_v51 = vadd.f32 %v116_v50, %v36_v48 }
  0xcc   :  { %v118_v52 = vpop.f32.mrf.mxu0 }
  0xcd   :  { %v119_v53 = vadd.f32 %v118_v52, %v40_v49  ;;  %v127_v56 = vmax.f32 %v117_v51, 0.0 }
  0xce   :  { %v122_v54 = vpop.f32.mrf.mxu0 }
  0xcf   :  { %v128_v55 = vmax.f32 %v119_v53, 0.0  ;;  %v123_v57 = vadd.f32 %v122_v54, %v36_v48 }
  0xd0   :  { %v124_v58 = vpop.f32.mrf.mxu0 }
  0xd1   :  { %v125_v59 = vadd.f32 %v124_v58, %v40_v49  ;;  %234 = vmatprep.mubr.f32.mxu1 %v128_v55  ;;  %v129_v61 = vmax.f32 %v123_v57, 0.0 }
  0xd2   :  { %235 = vmatmul.mubr.f32.vlgmr.msra.gmra.mxu1 %v127_v56 }
  0xd3   :  { %v130_v60 = vmax.f32 %v125_v59, 0.0 }
  0xd5   :  { %239 = vmatprep.mubr.f32.mxu1 %v130_v60 }
  0xd6   :  { %240 = vmatmul.mubr.f32.gmra.mxu1 %v129_v61 }
 0x192   :  { %v298_v62 = vpop.f32.mrf.mxu1 }
 0x194   :  { %v299_v0 = vpop.f32.mrf.mxu1 }
 0x195   :  { %v300_v1 = vadd.f32 %v299_v0, %v298_v62 }
 0x196   :  { %v301_v2 = vpop.f32.mrf.mxu1 }
 0x197   :  { %v237_v3 = vadd.f32 %v300_v1, %v265_v63 }
 0x198   :  { %v302_v4 = vpop.f32.mrf.mxu1 }
 0x199   :  { %245 = vst.msk [vmem:[#allocation2] sm:$0xff] %vm43_vm0, %v237_v3  ;;  %v303_v5 = vadd.f32 %v302_v4, %v301_v2 }
 0x19b   :  { %v242_v6 = vadd.f32 %v303_v5, %v265_v63 }
 0x19d   :  { %246 = vst.msk [vmem:[#allocation2 + $0x8] sm:$0xff] %vm43_vm0, %v242_v6 }
 0x19e   :  { %319 = shalt.err (!%p316_p4)
}
 0x19f   :  { %s332_s4 = smov 128   ;;  %s333_s27 = smov 8  }
 0x1a0   :  { %258 = dma.vmem_to_hbm [thread:$0]  %s253_s25, 256, %s508_s5, [#allocation3], %s332_s4, %s332_s4, %s333_s27  }
 0x1a1   :  { %328 = dma.done.wait [#allocation3], 256  }
 0x1a2   :  { %329 = vsyncadd [#allocation3], 4294967040 }
 0x1a3   :  { %262 = vsyncpa [#allocation3], 1 }

// kernel: tpu_custom_call.1
= control target key start
LH: loop header
LB: loop body
LE: loop exit
PB: predicated region body
PF: predicated region fallthrough
CT: control target
= control target key end

     0   :  { %v330_v4 = vmov 0.0   ;;  %vm43_vm0 = vcmask 261120   ;;  %s503_s0 = inlined_call_operand.vmem [shape: f32[16,32], index: 0, kind: input, shape index: {}]   ;;  %s504_s1 = inlined_call_operand.vmem [shape: f32[32,256], index: 1, kind: input, shape index: {}]   ;;  %s505_s2 = inlined_call_operand.vmem [shape: f32[1,256], index: 2, kind: input, shape index: {}]   ;;  %s506_s3 = inlined_call_operand.vmem [shape: f32[256,32], index: 3, kind: input, shape index: {}]   ;;  %s507_s4 = inlined_call_operand.vmem [shape: f32[1,32], index: 4, kind: input, shape index: {}]   ;;  %s508_s5 = inlined_call_operand.hbm [shape: f32[16,32], index: 5, kind: output, shape index: {}]  }
   0x1   :  { %v30_v0 = vld [vmem:[%s504_s1 + $0x38] sm:$0xff]  ;;  %v29_v1 = vld [vmem:[%s504_s1 + $0x30] sm:$0xff]  ;;  %v28_v2 = vld [vmem:[%s504_s1 + $0x28] sm:$0xff]  ;;  %114 = vmatprep.mubr.f32.mxu0 %v330_v4 }
   0x2   :  { %74 = vmatprep.subr.mxu0 %v30_v0  ;;  %v27_v3 = vld [vmem:[%s504_s1 + $0x20] sm:$0xff]  ;;  %v26_v5 = vld [vmem:[%s504_s1 + $0x18] sm:$0xff]  ;;  %v25_v6 = vld [vmem:[%s504_s1 + $0x10] sm:$0xff] }
   0x3   :  { %75 = vmatpush1.msra.mxu0 %v29_v1  ;;  %v162_v7 = vld [vmem:[%s506_s3 + $0xf8] sm:$0xff]  ;;  %v24_v9 = vld [vmem:[%s504_s1 + $0x8] sm:$0xff]  ;;  %v161_v10 = vld [vmem:[%s506_s3 + $0xf0] sm:$0xff] }
   0x4   :  { %76 = vmatprep.subr.mxu0 %v28_v2  ;;  %v146_v8 = vld [vmem:[%s506_s3 + $0x78] sm:$0xff]  ;;  %266 = vmatprep.subr.mxu1 %v162_v7  ;;  %v145_v11 = vld [vmem:[%s506_s3 + $0x70] sm:$0xff]  ;;  %v23_v12 = vld [vmem:[%s504_s1] sm:$0xff] }
   0x5   :  { %77 = vmatpush1.msra.mxu0 %v27_v3  ;;  %267 = vmatpush3.msra.mxu1 %v146_v8  ;;  %v160_v13 = vld [vmem:[%s506_s3 + $0xe8] sm:$0xff]  ;;  %v21_v14 = vld [vmem:[%s503_s0] sm:$0xff]  ;;  %v158_v18 = vld [vmem:[%s506_s3 + $0xd8] sm:$0xff] }
   0x6   :  { %78 = vmatprep.subr.mxu0 %v26_v5  ;;  %268 = vmatprep.subr.mxu1 %v161_v10  ;;  %v144_v15 = vld [vmem:[%s506_s3 + $0x68] sm:$0xff]  ;;  %v159_v16 = vld [vmem:[%s506_s3 + $0xe0] sm:$0xff]  ;;  %v142_v20 = vld [vmem:[%s506_s3 + $0x58] sm:$0xff] }
   0x7   :  { %79 = vmatpush1.msra.mxu0 %v25_v6  ;;  %269 = vmatpush3.msra.mxu1 %v145_v11  ;;  %v143_v17 = vld [vmem:[%s506_s3 + $0x60] sm:$0xff]  ;;  %v22_v19 = vld [vmem:[%s503_s0 + $0x8] sm:$0xff]  ;;  %v157_v21 = vld [vmem:[%s506_s3 + $0xd0] sm:$0xff] }
   0x8   :  { %80 = vmatprep.subr.mxu0 %v24_v9  ;;  %270 = vmatprep.subr.mxu1 %v160_v13 }
   0x9   :  { %81 = vmatpush1.msra.mxu0 %v23_v12  ;;  %271 = vmatpush3.msra.mxu1 %v144_v15 }
   0xa   :  { %263 = vmatmul.mubr.msk.f32.vlgmr.msra.gmra.mxu0 %vm43_vm0, %v21_v14  ;;  %272 = vmatprep.subr.mxu1 %v159_v16 }
   0xb   :  { %120 = vmatprep.mubr.f32.mxu0 %v330_v4  ;;  %273 = vmatpush3.msra.mxu1 %v143_v17 }
   0xc   :  { %10 = vsyncpa [#allocation3], 0  ;;  %274 = vmatprep.subr.mxu1 %v158_v18  ;;  %v141_v22 = vld [vmem:[%s506_s3 + $0x50] sm:$0xff]  ;;  %v156_v23 = vld [vmem:[%s506_s3 + $0xc8] sm:$0xff]  ;;  %v33_v43 = vlaneseq  ;;  %s331_s24 = smov [#allocation2]  }
   0xd   :  { %275 = vmatpush3.msra.mxu1 %v142_v20  ;;  %v140_v24 = vld [vmem:[%s506_s3 + $0x48] sm:$0xff]  ;;  %v155_v25 = vld [vmem:[%s506_s3 + $0xc0] sm:$0xff]  ;;  %v154_v27 = vld [vmem:[%s506_s3 + $0xb8] sm:$0xff]  ;;  %s252_s25 = sshll.u32 %s331_s24, 4  ;;  %s253_s25 = int_to_ptr.vmem [resolvable:$true] %s252_s25 }
   0xe   :  { %264 = vmatmul.mubr.msk.f32.gmra.mxu0 %vm43_vm0, %v22_v19  ;;  %276 = vmatprep.subr.mxu1 %v157_v21  ;;  %v139_v26 = vld [vmem:[%s506_s3 + $0x40] sm:$0xff]  ;;  %v138_v28 = vld [vmem:[%s506_s3 + $0x38] sm:$0xff]  ;;  %v153_v29 = vld [vmem:[%s506_s3 + $0xb0] sm:$0xff]  ;;  %v34_v44 = vshrl.u32 %v33_v43, 7  ;;  %s308_s26 = scalar_lea.vmem %s253_s25, 256  ;;  %p313_p1 = scmp.lt.s32.totalorder %s253_s25, %s253_s25 }
   0xf   :  { %277 = vmatpush3.msra.mxu1 %v141_v22  ;;  %v137_v30 = vld [vmem:[%s506_s3 + $0x30] sm:$0xff]  ;;  %v152_v31 = vld [vmem:[%s506_s3 + $0xa8] sm:$0xff]  ;;  %v151_v33 = vld [vmem:[%s506_s3 + $0xa0] sm:$0xff]  ;;  %p309_p0 = scmp.ne.s32.totalorder %s253_s25, %s308_s26  ;;  %p314_p2 = scmp.lt.s32.totalorder %s308_s26, %s308_s26 }
  0x10   :  { %278 = vmatprep.subr.mxu1 %v156_v23  ;;  %v136_v32 = vld [vmem:[%s506_s3 + $0x28] sm:$0xff]  ;;  %v135_v34 = vld [vmem:[%s506_s3 + $0x20] sm:$0xff]  ;;  %v150_v35 = vld [vmem:[%s506_s3 + $0x98] sm:$0xff]  ;;  %v35_v45 = vsub.s32 0, %v34_v44  ;;  %v39_v47 = vsub.s32 1, %v34_v44 }
  0x11   :  { %279 = vmatpush3.msra.mxu1 %v140_v24  ;;  %v134_v36 = vld [vmem:[%s506_s3 + $0x18] sm:$0xff]  ;;  %v149_v37 = vld [vmem:[%s506_s3 + $0x90] sm:$0xff]  ;;  %v148_v39 = vld [vmem:[%s506_s3 + $0x88] sm:$0xff]  ;;  %p315_p3 = por %p314_p2, %p313_p1 }
  0x12   :  { %280 = vmatprep.subr.mxu1 %v155_v25  ;;  %v133_v38 = vld [vmem:[%s506_s3 + $0x10] sm:$0xff]  ;;  %v132_v40 = vld [vmem:[%s506_s3 + $0x8] sm:$0xff]  ;;  %v147_v41 = vld [vmem:[%s506_s3 + $0x80] sm:$0xff] }
  0x13   :  { %281 = vmatpush3.msra.mxu1 %v139_v26  ;;  %v131_v42 = vld [vmem:[%s506_s3] sm:$0xff]  ;;  %p316_p4 = pnand %p315_p3, %p309_p0 }
  0x14   :  { %282 = vmatprep.subr.mxu1 %v154_v27  ;;  %v31_v46 = vld [vmem:[%s505_s2] sm:$0x3] }
  0x15   :  { %283 = vmatpush3.msra.mxu1 %v138_v28  ;;  %v36_v48 = vrot.slane %v31_v46, %v35_v45  ;;  %v40_v49 = vrot.slane %v31_v46, %v39_v47  ;;  %v265_v63 = vld [vmem:[%s507_s4] ss:$0 sm:$0xff] }
  0x16   :  { %284 = vmatprep.subr.mxu1 %v153_v29 }
  0x17   :  { %285 = vmatpush3.msra.mxu1 %v137_v30 }
  0x18   :  { %286 = vmatprep.subr.mxu1 %v152_v31 }
  0x19   :  { %287 = vmatpush3.msra.mxu1 %v136_v32 }
  0x1a   :  { %288 = vmatprep.subr.mxu1 %v151_v33 }
  0x1b   :  { %289 = vmatpush3.msra.mxu1 %v135_v34 }
  0x1c   :  { %290 = vmatprep.subr.mxu1 %v150_v35 }
  0x1d   :  { %291 = vmatpush3.msra.mxu1 %v134_v36 }
  0x1e   :  { %292 = vmatprep.subr.mxu1 %v149_v37 }
  0x1f   :  { %293 = vmatpush3.msra.mxu1 %v133_v38 }
  0x20   :  { %294 = vmatprep.subr.mxu1 %v148_v39 }
  0x21   :  { %295 = vmatpush3.msra.mxu1 %v132_v40 }
  0x22   :  { %296 = vmatprep.subr.mxu1 %v147_v41 }
  0x23   :  { %297 = vmatpush3.msra.mxu1 %v131_v42 }
  0xca   :  { %v116_v50 = vpop.f32.mrf.mxu0 }
  0xcb   :  { %v117_v51 = vadd.f32 %v116_v50, %v36_v48 }
  0xcc   :  { %v118_v52 = vpop.f32.mrf.mxu0 }
  0xcd   :  { %v119_v53 = vadd.f32 %v118_v52, %v40_v49  ;;  %v127_v56 = vmax.f32 %v117_v51, 0.0 }
  0xce   :  { %v122_v54 = vpop.f32.mrf.mxu0 }
  0xcf   :  { %v128_v55 = vmax.f32 %v119_v53, 0.0  ;;  %v123_v57 = vadd.f32 %v122_v54, %v36_v48 }
  0xd0   :  { %v124_v58 = vpop.f32.mrf.mxu0 }
  0xd1   :  { %v125_v59 = vadd.f32 %v124_v58, %v40_v49  ;;  %234 = vmatprep.mubr.f32.mxu1 %v128_v55  ;;  %v129_v61 = vmax.f32 %v123_v57, 0.0 }
  0xd2   :  { %235 = vmatmul.mubr.f32.vlgmr.msra.gmra.mxu1 %v127_v56 }
  0xd3   :  { %v130_v60 = vmax.f32 %v125_v59, 0.0 }
  0xd5   :  { %239 = vmatprep.mubr.f32.mxu1 %v130_v60 }
  0xd6   :  { %240 = vmatmul.mubr.f32.gmra.mxu1 %v129_v61 }
 0x192   :  { %v298_v62 = vpop.f32.mrf.mxu1 }
 0x194   :  { %v299_v0 = vpop.f32.mrf.mxu1 }
 0x195   :  { %v300_v1 = vadd.f32 %v299_v0, %v298_v62 }
 0x196   :  { %v301_v2 = vpop.f32.mrf.mxu1 }
 0x197   :  { %v237_v3 = vadd.f32 %v300_v1, %v265_v63 }
 0x198   :  { %v302_v4 = vpop.f32.mrf.mxu1 }
 0x199   :  { %245 = vst.msk [vmem:[#allocation2] sm:$0xff] %vm43_vm0, %v237_v3  ;;  %v303_v5 = vadd.f32 %v302_v4, %v301_v2 }
 0x19b   :  { %v242_v6 = vadd.f32 %v303_v5, %v265_v63 }
 0x19d   :  { %246 = vst.msk [vmem:[#allocation2 + $0x8] sm:$0xff] %vm43_vm0, %v242_v6 }
 0x19e   :  { %319 = shalt.err (!%p316_p4)
}
 0x19f   :  { %s332_s4 = smov 128   ;;  %s333_s27 = smov 8  }
 0x1a0   :  { %258 = dma.vmem_to_hbm [thread:$0]  %s253_s25, 256, %s508_s5, [#allocation3], %s332_s4, %s332_s4, %s333_s27  }
 0x1a1   :  { %328 = dma.done.wait [#allocation3], 256  }
 0x1a2   :  { %329 = vsyncadd [#allocation3], 4294967040 }
 0x1a3   :  { %262 = vsyncpa [#allocation3], 1 }

</bundles_post_ra>
